<compile_context>
chip_gen: v5e
topology: v5e:2x2
jax: 0.10.0
libtpu: 0.0.40
codegen_flags: <defaults>
</compile_context>

<pallas_src>
import math

import jax
import jax.numpy as jnp
import numpy as np
from jax import lax
from jax.experimental import pallas as pl
from jax.experimental.pallas import tpu as pltpu

# Make the pure-JAX reference matmuls run in full f32 so the f32 kernel path can
# be checked tightly.
jax.config.update("jax_default_matmul_precision", "highest")


def _vmem_limit_bytes():
    """Per-generation VMEM limit with headroom for compiler scratch."""
    try:
        phys = int(pltpu.get_tpu_info().vmem_capacity_bytes)
    except Exception:
        phys = 64 * 1024 * 1024            # safe on every generation
    return max(32 * 1024 * 1024, phys - 16 * 1024 * 1024)


_VMEM_LIMIT = _vmem_limit_bytes()


def _sublane_align(*dtypes):
    """Sublane alignment for row tiles: bf16 packs 16 rows, f32 packs 8."""
    return 16 if any(jnp.dtype(d) == jnp.dtype(jnp.bfloat16) for d in dtypes) else 8


def _tile(n, target, align):
    """Largest legal block size <= target for a dim of size n (or the full dim)."""
    if n <= target:
        return n
    return max(align, (target // align) * align)


def _pick_kv_tile(tgk, target, sub_align, lane_constrained):
    """KV tile that divides Tgk exactly (partial KV blocks would corrupt softmax)."""
    if tgk <= target:
        return tgk
    step = 128 if lane_constrained else sub_align
    cand = (min(target, tgk) // step) * step
    while cand >= step:
        if tgk % cand == 0:
            return cand
        cand -= step
    return tgk


# ----------------------------------------------------------------------------
# Kernel 1: tiled linear  y = x @ W^T + b   (W stays in PyTorch (Dout, Din)
# layout; the transpose is expressed as a dot_general contraction, not in HBM)
# ----------------------------------------------------------------------------
def _make_linear_kernel(compute_dtype):
    def kernel(x_ref, w_ref, b_ref, o_ref):
        x = x_ref[...].astype(compute_dtype)
        w = w_ref[...].astype(compute_dtype)            # (bn, Din)
        y = lax.dot_general(x, w, (((1,), (1,)), ((), ())),
                            preferred_element_type=jnp.float32)
        o_ref[...] = (y + b_ref[...]).astype(o_ref.dtype)
    return kernel


def pallas_linear(x, weight, bias, *, compute_dtype=None, out_dtype=None,
                  tm=512, tn=512):
    """x: (N, Din), weight: (Dout, Din) [PyTorch layout, untransposed], bias: (Dout,)."""
    n, din = x.shape
    dout = weight.shape[0]
    cd = compute_dtype or x.dtype
    od = out_dtype or x.dtype
    sub = _sublane_align(x.dtype, od, cd)
    x_it, w_it, o_it = (jnp.dtype(t).itemsize for t in (x.dtype, weight.dtype, od))

    # Keep the whole weight VMEM-resident (single DMA) whenever it is small enough.
    bn = dout if din * dout * w_it <= min(_VMEM_LIMIT // 4, 16 << 20) \
        else _tile(dout, tn, 128)
    bm = _tile(n, tm, sub)
    budget = int(0.7 * _VMEM_LIMIT)
    while bm > sub and (2 * bm * (din * x_it + bn * o_it) + 2 * din * bn * w_it) > budget:
        bm = max(sub, ((bm // 2) // sub) * sub)

    grid = (pl.cdiv(n, bm), pl.cdiv(dout, bn))
    return pl.pallas_call(
        _make_linear_kernel(cd),
        out_shape=jax.ShapeDtypeStruct((n, dout), od),
        grid=grid,
        in_specs=[
            pl.BlockSpec((bm, din), lambda i, j: (i, 0)),
            pl.BlockSpec((bn, din), lambda i, j: (j, 0)),
            pl.BlockSpec((1, bn), lambda i, j: (0, j)),
        ],
        out_specs=pl.BlockSpec((bm, bn), lambda i, j: (i, j)),
        compiler_params=pltpu.CompilerParams(
            dimension_semantics=("parallel", "parallel"),
            vmem_limit_bytes=_VMEM_LIMIT,
        ),
    )(x, weight, bias.astype(jnp.float32).reshape(1, dout))


# ----------------------------------------------------------------------------
# Kernel 2: fused Q/K/V projections (self-attention): x read once per tile,
# three transpose-free matmuls, three lane-dense outputs.
# ----------------------------------------------------------------------------
def _make_qkv_kernel(compute_dtype):
    def kernel(x_ref, wq_ref, wk_ref, wv_ref, bq_ref, bk_ref, bv_ref,
               q_ref, k_ref, v_ref):
        x = x_ref[...].astype(compute_dtype)
        for w_ref, b_ref, o_ref in ((wq_ref, bq_ref, q_ref),
                                    (wk_ref, bk_ref, k_ref),
                                    (wv_ref, bv_ref, v_ref)):
            y = lax.dot_general(x, w_ref[...].astype(compute_dtype),
                                (((1,), (1,)), ((), ())),
                                preferred_element_type=jnp.float32)
            o_ref[...] = (y + b_ref[...]).astype(o_ref.dtype)
    return kernel


def pallas_qkv_linear(x, wq, wk, wv, bq, bk, bv, *, compute_dtype=None,
                      out_dtype=None, tm=512, tn=512):
    n, din = x.shape
    dout = wq.shape[0]
    cd = compute_dtype or x.dtype
    od = out_dtype or x.dtype
    sub = _sublane_align(x.dtype, od, cd)
    x_it, w_it, o_it = (jnp.dtype(t).itemsize for t in (x.dtype, wq.dtype, od))

    bn = dout if 3 * din * dout * w_it <= min(_VMEM_LIMIT // 3, 24 << 20) \
        else _tile(dout, tn, 128)
    bm = _tile(n, tm, sub)
    budget = int(0.7 * _VMEM_LIMIT)
    while bm > sub and (2 * bm * din * x_it + 6 * bm * bn * o_it
                        + 6 * din * bn * w_it) > budget:
        bm = max(sub, ((bm // 2) // sub) * sub)

    grid = (pl.cdiv(n, bm), pl.cdiv(dout, bn))
    x_spec = pl.BlockSpec((bm, din), lambda i, j: (i, 0))
    w_spec = pl.BlockSpec((bn, din), lambda i, j: (j, 0))
    b_spec = pl.BlockSpec((1, bn), lambda i, j: (0, j))
    o_spec = pl.BlockSpec((bm, bn), lambda i, j: (i, j))
    out_sds = jax.ShapeDtypeStruct((n, dout), od)
    return pl.pallas_call(
        _make_qkv_kernel(cd),
        out_shape=(out_sds, out_sds, out_sds),
        grid=grid,
        in_specs=[x_spec, w_spec, w_spec, w_spec, b_spec, b_spec, b_spec],
        out_specs=(o_spec, o_spec, o_spec),
        compiler_params=pltpu.CompilerParams(
            dimension_semantics=("parallel", "parallel"),
            vmem_limit_bytes=_VMEM_LIMIT,
        ),
    )(x, wq, wk, wv,
      bq.astype(jnp.float32).reshape(1, dout),
      bk.astype(jnp.float32).reshape(1, dout),
      bv.astype(jnp.float32).reshape(1, dout))


# ----------------------------------------------------------------------------
# Kernel 3a: grouped attention, whole-KV per q-tile, attention weights returned.
# Inputs are the grouped layout (B, Tg, G*D); heads are static lane slices.
# ----------------------------------------------------------------------------
def _make_grouped_attn_kernel(num_heads, dim_head, bias_mode):
    scale = 1.0 / math.sqrt(dim_head)
    aligned = dim_head % 128 == 0

    def kernel(*refs):
        q_ref, k_ref, v_ref = refs[0], refs[1], refs[2]
        idx = 3
        bias_ref = None
        if bias_mode != "none":
            bias_ref = refs[idx]
            idx += 1
        o_ref, w_ref = refs[idx], refs[idx + 1]

        # kpad bias: (1, Tk); full bias: (Tq_tile, Tk) -- both broadcast over rows.
        bias = bias_ref[0] if bias_ref is not None else None

        head_outs = []
        for h in range(num_heads):                     # static unrolled loop
            sl = pl.ds(h * dim_head, dim_head)
            qh = q_ref[0, :, sl]                       # (Tq_tile, dh)
            kh = k_ref[0, :, sl]                       # (Tk, dh)
            vh = v_ref[0, :, sl]                       # (Tk, dh)
            s = lax.dot_general(qh, kh, (((1,), (1,)), ((), ())),
                                preferred_element_type=jnp.float32) * scale
            if bias is not None:
                s = s + bias
            m = jnp.max(s, axis=-1, keepdims=True)
            e = jnp.exp(s - m)
            att = e / jnp.sum(e, axis=-1, keepdims=True)   # exact: weights returned
            w_ref[0, h] = att.astype(w_ref.dtype)
            out_h = jnp.dot(att.astype(vh.dtype), vh,
                            preferred_element_type=jnp.float32)
            if aligned:
                o_ref[0, :, sl] = out_h.astype(o_ref.dtype)
            else:
                head_outs.append(out_h)
        if not aligned:
            o_ref[0] = jnp.concatenate(head_outs, axis=-1).astype(o_ref.dtype)

    return kernel


def pallas_grouped_attention(qg, kg, vg, num_heads, dim_head, *, bias=None,
                             bias_mode="none", weights_dtype=jnp.float32,
                             q_tile=256):
    """qg: (B, Tgq, G*D), kg/vg: (B, Tgk, G*D). Returns (output, weights)."""
    B, Tgq, GD = qg.shape
    Tgk = kg.shape[1]
    sub = _sublane_align(qg.dtype, weights_dtype)
    bq_t = _tile(Tgq, q_tile, sub)
    grid = (B, pl.cdiv(Tgq, bq_t))

    in_specs = [pl.BlockSpec((1, bq_t, GD), lambda b, i: (b, i, 0)),
                pl.BlockSpec((1, Tgk, GD), lambda b, i: (b, 0, 0)),
                pl.BlockSpec((1, Tgk, GD), lambda b, i: (b, 0, 0))]
    args = [qg, kg, vg]
    if bias_mode == "kpad":
        in_specs.append(pl.BlockSpec((1, 1, Tgk), lambda b, i: (b, 0, 0)))
        args.append(bias)
    elif bias_mode == "full":
        in_specs.append(pl.BlockSpec((1, bq_t, Tgk), lambda b, i: (b, i, 0)))
        args.append(bias)

    out_shape = (jax.ShapeDtypeStruct((B, Tgq, GD), qg.dtype),
                 jax.ShapeDtypeStruct((B, num_heads, Tgq, Tgk), weights_dtype))
    out_specs = (pl.BlockSpec((1, bq_t, GD), lambda b, i: (b, i, 0)),
                 pl.BlockSpec((1, num_heads, bq_t, Tgk), lambda b, i: (b, 0, i, 0)))

    return pl.pallas_call(
        _make_grouped_attn_kernel(num_heads, dim_head, bias_mode),
        out_shape=out_shape,
        grid=grid,
        in_specs=in_specs,
        out_specs=out_specs,
        compiler_params=pltpu.CompilerParams(
            dimension_semantics=("parallel", "parallel"),
            vmem_limit_bytes=_VMEM_LIMIT,
        ),
    )(*args)


# ----------------------------------------------------------------------------
# Kernel 3b: flash-style grouped attention (online softmax over a KV grid axis).
# Used when attention weights are not needed; VMEM is O(q_tile * kv_tile).
# ----------------------------------------------------------------------------
def _make_grouped_flash_kernel(num_heads, dim_head, bias_mode):
    scale = 1.0 / math.sqrt(dim_head)
    aligned = dim_head % 128 == 0

    def kernel(*refs):
        q_ref, k_ref, v_ref = refs[0], refs[1], refs[2]
        idx = 3
        bias_ref = None
        if bias_mode != "none":
            bias_ref = refs[idx]
            idx += 1
        o_ref = refs[idx]
        m_sc, l_sc, acc_sc = refs[idx + 1], refs[idx + 2], refs[idx + 3]

        kv = pl.program_id(2)

        @pl.when(kv == 0)
        def _():
            m_sc[...] = jnp.full(m_sc.shape, -jnp.inf, m_sc.dtype)
            l_sc[...] = jnp.zeros(l_sc.shape, l_sc.dtype)
            acc_sc[...] = jnp.zeros(acc_sc.shape, acc_sc.dtype)

        bias = bias_ref[0] if bias_ref is not None else None

        for h in range(num_heads):                     # static unrolled loop
            sl = pl.ds(h * dim_head, dim_head)
            qh = q_ref[0, :, sl]
            kh = k_ref[0, :, sl]
            vh = v_ref[0, :, sl]
            s = lax.dot_general(qh, kh, (((1,), (1,)), ((), ())),
                                preferred_element_type=jnp.float32) * scale
            if bias is not None:
                s = s + bias
            m_prev = m_sc[h]                                        # (bq, 1)
            m_new = jnp.maximum(m_prev, jnp.max(s, axis=-1, keepdims=True))
            alpha = jnp.exp(m_prev - m_new)
            p = jnp.exp(s - m_new)
            l_sc[h] = alpha * l_sc[h] + jnp.sum(p, axis=-1, keepdims=True)
            acc_sc[h] = alpha * acc_sc[h] + jnp.dot(
                p.astype(vh.dtype), vh, preferred_element_type=jnp.float32)
            m_sc[h] = m_new

        @pl.when(kv == pl.num_programs(2) - 1)
        def _():
            outs = [acc_sc[h] * pl.reciprocal(l_sc[h], approx=True)
                    for h in range(num_heads)]
            if aligned:
                for h in range(num_heads):
                    o_ref[0, :, pl.ds(h * dim_head, dim_head)] = \
                        outs[h].astype(o_ref.dtype)
            else:
                o_ref[0] = jnp.concatenate(outs, axis=-1).astype(o_ref.dtype)

    return kernel


def pallas_grouped_flash_attention(qg, kg, vg, num_heads, dim_head, *, bias=None,
                                   bias_mode="none", q_tile=256, kv_tile=512):
    B, Tgq, GD = qg.shape
    Tgk = kg.shape[1]
    sub = _sublane_align(qg.dtype)
    bq_t = _tile(Tgq, q_tile, sub)
    bkv = _pick_kv_tile(Tgk, kv_tile, sub, lane_constrained=(bias_mode != "none"))
    grid = (B, pl.cdiv(Tgq, bq_t), Tgk // bkv)

    in_specs = [pl.BlockSpec((1, bq_t, GD), lambda b, i, k: (b, i, 0)),
                pl.BlockSpec((1, bkv, GD), lambda b, i, k: (b, k, 0)),
                pl.BlockSpec((1, bkv, GD), lambda b, i, k: (b, k, 0))]
    args = [qg, kg, vg]
    if bias_mode == "kpad":
        in_specs.append(pl.BlockSpec((1, 1, bkv), lambda b, i, k: (b, 0, k)))
        args.append(bias)
    elif bias_mode == "full":
        in_specs.append(pl.BlockSpec((1, bq_t, bkv), lambda b, i, k: (b, i, k)))
        args.append(bias)

    return pl.pallas_call(
        _make_grouped_flash_kernel(num_heads, dim_head, bias_mode),
        out_shape=jax.ShapeDtypeStruct((B, Tgq, GD), qg.dtype),
        grid=grid,
        in_specs=in_specs,
        out_specs=pl.BlockSpec((1, bq_t, GD), lambda b, i, k: (b, i, 0)),
        scratch_shapes=[pltpu.VMEM((num_heads, bq_t, 1), jnp.float32),
                        pltpu.VMEM((num_heads, bq_t, 1), jnp.float32),
                        pltpu.VMEM((num_heads, bq_t, dim_head), jnp.float32)],
        compiler_params=pltpu.CompilerParams(
            dimension_semantics=("parallel", "parallel", "arbitrary"),
            vmem_limit_bytes=_VMEM_LIMIT,
        ),
    )(*args)


# ----------------------------------------------------------------------------
# GroupedMultiHeadAttention.forward
# ----------------------------------------------------------------------------
def grouped_multi_head_attention(params, Q, K, V, num_heads, group_size,
                                 mask=None, need_weights=True,
                                 compute_dtype=jnp.float32,
                                 weights_dtype=jnp.float32,
                                 q_tile=None, kv_tile=512):
    B, Tq, D = Q.shape
    Tk = K.shape[1]
    H, G = num_heads, group_size
    dim_head = G * D // H
    GD = G * D
    cd = compute_dtype

    if mask is not None and mask.shape[1] != 1:
        # TODO(synk): per-head masks are not supported by the grouped kernels.
        raise NotImplementedError("per-head masks (mask.shape[1] > 1) not supported")

    # --- Q/K/V projections (fused when self-attention). Weights stay (Dout, Din)
    # in HBM; transpose-free contraction + compute-dtype cast happen in-kernel. ---
    if (Q is K) and (K is V):
        x = Q.reshape(B * Tq, D)
        q2, k2, v2 = pallas_qkv_linear(
            x, params["wq"], params["wk"], params["wv"],
            params["bq"], params["bk"], params["bv"],
            compute_dtype=cd, out_dtype=cd)
    else:
        q2 = pallas_linear(Q.reshape(B * Tq, D), params["wq"], params["bq"],
                           compute_dtype=cd, out_dtype=cd)
        k2 = pallas_linear(K.reshape(B * Tk, D), params["wk"], params["bk"],
                           compute_dtype=cd, out_dtype=cd)
        v2 = pallas_linear(V.reshape(B * Tk, D), params["wv"], params["bv"],
                           compute_dtype=cd, out_dtype=cd)
    q3 = q2.reshape(B, Tq, D)
    k3 = k2.reshape(B, Tk, D)
    v3 = v2.reshape(B, Tk, D)

    # --- pad sequence lengths to a multiple of group_size (module .pad()) ---
    pad_q = (-Tq) % G
    pad_k = (-Tk) % G
    if pad_q:
        q3 = jnp.pad(q3, ((0, 0), (0, pad_q), (0, 0)))
    if pad_k:
        k3 = jnp.pad(k3, ((0, 0), (0, pad_k), (0, 0)))
        v3 = jnp.pad(v3, ((0, 0), (0, pad_k), (0, 0)))

    Tgq = (Tq + pad_q) // G
    Tgk = (Tk + pad_k) // G

    # --- mask -> additive bias (compact (B,1,Tgk) for key-padding masks) ---
    bias, bias_mode = None, "none"
    if mask is not None:
        mask = mask.astype(jnp.float32)
        if mask.shape[2] == 1:
            # Key-padding mask: the ::group_size stride never samples padded key
            # positions, so torch's F.pad of the mask is a no-op here.
            bias = jnp.broadcast_to(mask[:, 0, :, ::G], (B, 1, Tgk)) * jnp.float32(-1e9)
            bias_mode = "kpad"
        else:
            # NOTE: pad axes match the original torch F.pad(mask,(0,pad_q,0,pad_k)).
            if pad_q or pad_k:
                mask = jnp.pad(mask, ((0, 0), (0, 0), (0, pad_k), (0, pad_q)),
                               constant_values=1.0)
            bias = jnp.broadcast_to(mask[:, 0, ::G, ::G],
                                    (B, Tgq, Tgk)) * jnp.float32(-1e9)
            bias_mode = "full"
    # mask is None + pad_k: the synthesized torch padding mask is identically
    # zero after the ::group_size stride, so no bias is needed at all.

    # --- grouped head split: free reshape, no HBM transposes ---
    qg = q3.reshape(B, Tgq, GD)
    kg = k3.reshape(B, Tgk, GD)
    vg = v3.reshape(B, Tgk, GD)

    if q_tile is None:
        q_tile = 256 if _VMEM_LIMIT >= (80 << 20) else 128   # smaller on v7x

    if need_weights:
        og, att_w = pallas_grouped_attention(
            qg, kg, vg, H, dim_head, bias=bias, bias_mode=bias_mode,
            weights_dtype=weights_dtype, q_tile=q_tile)
    else:
        og = pallas_grouped_flash_attention(
            qg, kg, vg, H, dim_head, bias=bias, bias_mode=bias_mode,
            q_tile=q_tile, kv_tile=kv_tile)
        att_w = None

    # --- ungroup (free reshape), drop query padding, output projection ---
    o = og.reshape(B, Tgq * G, D)[:, :Tq]
    o = pallas_linear(o.reshape(B * Tq, D), params["wo"], params["bo"],
                      compute_dtype=cd, out_dtype=jnp.float32).reshape(B, Tq, D)
    return o, att_w


# ----------------------------------------------------------------------------
# Deterministic parameter init (mimics nn.Linear's U(-1/sqrt(fan_in), ...))
# TODO(synk): synaptic-noise (vn_std / sample_synaptic_noise) training path of
#             the custom Linear is not implemented (inference forward only).
# ----------------------------------------------------------------------------
def init_params(key, dim_model):
    bound = 1.0 / (dim_model ** 0.5)
    keys = jax.random.split(key, 8)
    names = ["wq", "bq", "wk", "bk", "wv", "bv", "wo", "bo"]
    params = {}
    for i, name in enumerate(names):
        shape = (dim_model, dim_model) if name.startswith("w") else (dim_model,)
        params[name] = jax.random.uniform(
            keys[i], shape, jnp.float32, minval=-bound, maxval=bound)
    return params


# ----------------------------------------------------------------------------
# Pure-JAX reference (mirrors the PyTorch GroupedMultiHeadAttention forward)
# ----------------------------------------------------------------------------
def reference_grouped_mha(params, Q, K, V, num_heads, group_size, mask=None):
    B, Tq, D = Q.shape
    Tk = K.shape[1]
    H, G = num_heads, group_size
    dim_head = G * D // H

    def lin(x, w, b):
        return x @ w.T + b

    q = lin(Q, params["wq"], params["bq"])
    k = lin(K, params["wk"], params["bk"])
    v = lin(V, params["wv"], params["bv"])

    pad_q = (-Tq) % G
    pad_k = (-Tk) % G
    q = jnp.pad(q, ((0, 0), (0, pad_q), (0, 0)))
    k = jnp.pad(k, ((0, 0), (0, pad_k), (0, 0)))
    v = jnp.pad(v, ((0, 0), (0, pad_k), (0, 0)))
    if mask is not None:
        mask = mask.astype(jnp.float32)
        if mask.shape[2] == 1:
            mask = jnp.pad(mask, ((0, 0), (0, 0), (0, 0), (0, pad_k)),
                           constant_values=1.0)
        else:
            mask = jnp.pad(mask, ((0, 0), (0, 0), (0, pad_k), (0, pad_q)),
                           constant_values=1.0)
    elif pad_k:
        mask = jnp.pad(jnp.zeros((B, 1, 1, Tk), jnp.float32),
                       ((0, 0), (0, 0), (0, 0), (0, pad_k)), constant_values=1.0)

    qh = q.reshape(B, -1, H, dim_head).transpose(0, 2, 1, 3)
    kh = k.reshape(B, -1, H, dim_head).transpose(0, 2, 1, 3)
    vh = v.reshape(B, -1, H, dim_head).transpose(0, 2, 1, 3)
    scores = jnp.einsum("bhqd,bhkd->bhqk", qh, kh) / (dim_head ** 0.5)
    if mask is not None:
        scores = scores + mask[:, :, ::G, ::G] * (-1e9)
    att = jax.nn.softmax(scores, axis=-1)
    o = jnp.einsum("bhqk,bhkd->bhqd", att, vh).transpose(0, 2, 1, 3)
    o = o.reshape(B, -1, D)[:, :Tq]
    o = lin(o, params["wo"], params["bo"])
    return o, att


if __name__ == "__main__":
    B, T, D, H, G = 2, 16, 32, 4, 2

    key = jax.random.PRNGKey(0)
    kp, kx, kq, kk, kv2, km, kx3 = jax.random.split(key, 7)
    params = init_params(kp, D)

    def check(a, b, tol=1e-2):
        a = np.asarray(jnp.asarray(a, jnp.float32))
        b = np.asarray(jnp.asarray(b, jnp.float32))
        np.testing.assert_allclose(a, b, rtol=tol, atol=tol)

    # 1) self-attention: fused QKV + whole-KV kernel, weights returned
    X = jax.random.normal(kx, (B, T, D), jnp.float32)
    O, att_w = grouped_multi_head_attention(params, X, X, X, H, G)
    jax.block_until_ready(O)
    O_ref, att_ref = reference_grouped_mha(params, X, X, X, H, G)
    check(O, O_ref)
    check(att_w, att_ref)

    # 2) need_weights=False -> flash kernel (no O(T^2) weights writeback)
    O_nw, att_nw = grouped_multi_head_attention(params, X, X, X, H, G,
                                                need_weights=False)
    jax.block_until_ready(O_nw)
    assert att_nw is None
    check(O_nw, O_ref)

    # 3) explicit key-padding mask -> compact (B,1,Tgk) in-kernel bias
    lengths = jnp.array([12, 9])
    kmask = (jnp.arange(T)[None, :] >= lengths[:, None]).astype(jnp.float32)
    kmask = kmask[:, None, None, :]                              # (B,1,1,T)
    O_m, att_m = grouped_multi_head_attention(params, X, X, X, H, G, mask=kmask)
    jax.block_until_ready(O_m)
    O_mr, att_mr = reference_grouped_mha(params, X, X, X, H, G, mask=kmask)
    check(O_m, O_mr)
    check(att_m, att_mr)
    O_mf, _ = grouped_multi_head_attention(params, X, X, X, H, G, mask=kmask,
                                           need_weights=False)
    jax.block_until_ready(O_mf)
    check(O_mf, O_mr)

    # 4) full (B,1,T,T) mask path (whole-KV and flash)
    fmask = (jax.random.uniform(km, (B, 1, T, T)) > 0.8).astype(jnp.float32)
    O_f, att_f = grouped_multi_head_attention(params, X, X, X, H, G, mask=fmask)
    jax.block_until_ready(O_f)
    O_fr, att_fr = reference_grouped_mha(params, X, X, X, H, G, mask=fmask)
    check(O_f, O_fr)
    check(att_f, att_fr)
    O_ff, _ = grouped_multi_head_attention(params, X, X, X, H, G, mask=fmask,
                                           need_weights=False)
    jax.block_until_ready(O_ff)
    check(O_ff, O_fr)

    # 5) cross-attention, ragged lengths -> padding path + separate projections
    Tq2, Tk2 = 15, 11
    Q2 = jax.random.normal(kq, (B, Tq2, D), jnp.float32)
    K2 = jax.random.normal(kk, (B, Tk2, D), jnp.float32)
    V2 = jax.random.normal(kv2, (B, Tk2, D), jnp.float32)
    O2, att2 = grouped_multi_head_attention(params, Q2, K2, V2, H, G)
    jax.block_until_ready(O2)
    O2_ref, att2_ref = reference_grouped_mha(params, Q2, K2, V2, H, G)
    check(O2, O2_ref)
    check(att2, att2_ref)

    # 6) multi-tile grids: q tiling (whole-KV) and q+KV tiling (flash online softmax)
    T3 = 64
    X3 = jax.random.normal(kx3, (B, T3, D), jnp.float32)
    O3_ref, att3_ref = reference_grouped_mha(params, X3, X3, X3, H, G)
    O3w, att3 = grouped_multi_head_attention(params, X3, X3, X3, H, G, q_tile=8)
    jax.block_until_ready(O3w)
    check(O3w, O3_ref)
    check(att3, att3_ref)
    O3f, _ = grouped_multi_head_attention(params, X3, X3, X3, H, G,
                                          need_weights=False, q_tile=8, kv_tile=16)
    jax.block_until_ready(O3f)
    check(O3f, O3_ref)

    # 7) bf16 MXU path (f32 accumulation + f32 softmax), bf16 attention weights
    O_bf, att_bf = grouped_multi_head_attention(params, X, X, X, H, G,
                                                compute_dtype=jnp.bfloat16,
                                                weights_dtype=jnp.bfloat16)
    jax.block_until_ready(O_bf)
    check(O_bf, O_ref, tol=1e-1)
    check(att_bf, att_ref, tol=1e-1)

    print("KERNEL_OK")
</pallas_src>

<mosaic_0001>
module attributes {stable_mosaic.version = 11 : i64} {
  func.func @kernel(%arg0: i32, %arg1: i32, %arg2: memref<32x32xf32, #tpu.memory_space<vmem>>, %arg3: memref<32x32xf32, #tpu.memory_space<vmem>>, %arg4: memref<32x32xf32, #tpu.memory_space<vmem>>, %arg5: memref<32x32xf32, #tpu.memory_space<vmem>>, %arg6: memref<1x32xf32, #tpu.memory_space<vmem>>, %arg7: memref<1x32xf32, #tpu.memory_space<vmem>>, %arg8: memref<1x32xf32, #tpu.memory_space<vmem>>, %arg9: memref<32x32xf32, #tpu.memory_space<vmem>>, %arg10: memref<32x32xf32, #tpu.memory_space<vmem>>, %arg11: memref<32x32xf32, #tpu.memory_space<vmem>>) attributes {dimension_semantics = [#tpu.dimension_semantics<parallel>, #tpu.dimension_semantics<parallel>], iteration_bounds = array<i64: 1, 1>, scalar_prefetch = 0 : i64, scratch_operands = 0 : i64, tpu.core_type = #tpu.core_type<tc>, window_params = [{transform_indices = @transform_0, window_bounds = array<i64: 32, 32>}, {transform_indices = @transform_1, window_bounds = array<i64: 32, 32>}, {transform_indices = @transform_2, window_bounds = array<i64: 32, 32>}, {transform_indices = @transform_3, window_bounds = array<i64: 32, 32>}, {transform_indices = @transform_4, window_bounds = array<i64: 1, 32>}, {transform_indices = @transform_5, window_bounds = array<i64: 1, 32>}, {transform_indices = @transform_6, window_bounds = array<i64: 1, 32>}, {transform_indices = @transform_7, window_bounds = array<i64: 32, 32>}, {transform_indices = @transform_8, window_bounds = array<i64: 32, 32>}, {transform_indices = @transform_9, window_bounds = array<i64: 32, 32>}]} {
    %c0 = arith.constant 0 : index
    %c0_0 = arith.constant 0 : index
    %0 = vector.load %arg2[%c0, %c0_0] : memref<32x32xf32, #tpu.memory_space<vmem>>, vector<32x32xf32>
    %c0_1 = arith.constant 0 : index
    %c0_2 = arith.constant 0 : index
    %1 = vector.load %arg3[%c0_1, %c0_2] : memref<32x32xf32, #tpu.memory_space<vmem>>, vector<32x32xf32>
    %cst = arith.constant dense<0.000000e+00> : vector<32x32xf32>
    %2 = tpu.matmul %0, %1, %cst {dimension_numbers = #tpu.dot_dimension_numbers<[1], [1], [0], [0], [0, 0, 1, 0], [], []>, precision = #tpu.contract_precision<fp32>} : vector<32x32xf32>, vector<32x32xf32>, vector<32x32xf32> -> vector<32x32xf32>
    %c0_3 = arith.constant 0 : index
    %c0_4 = arith.constant 0 : index
    %3 = vector.load %arg6[%c0_3, %c0_4] : memref<1x32xf32, #tpu.memory_space<vmem>>, vector<1x32xf32>
    %4 = vector.broadcast %3 : vector<1x32xf32> to vector<32x32xf32>
    %5 = arith.addf %2, %4 : vector<32x32xf32>
    %c0_5 = arith.constant 0 : index
    %c0_6 = arith.constant 0 : index
    %6 = vector.load %arg9[%c0_5, %c0_6] : memref<32x32xf32, #tpu.memory_space<vmem>>, vector<32x32xf32>
    tpu.vector_store %arg9[%c0_5, %c0_6], %5 {strides = array<i32>} : memref<32x32xf32, #tpu.memory_space<vmem>>, vector<32x32xf32>,
    %c0_7 = arith.constant 0 : index
    %c0_8 = arith.constant 0 : index
    %7 = vector.load %arg4[%c0_7, %c0_8] : memref<32x32xf32, #tpu.memory_space<vmem>>, vector<32x32xf32>
    %cst_9 = arith.constant dense<0.000000e+00> : vector<32x32xf32>
    %8 = tpu.matmul %0, %7, %cst_9 {dimension_numbers = #tpu.dot_dimension_numbers<[1], [1], [0], [0], [0, 0, 1, 0], [], []>, precision = #tpu.contract_precision<fp32>} : vector<32x32xf32>, vector<32x32xf32>, vector<32x32xf32> -> vector<32x32xf32>
    %c0_10 = arith.constant 0 : index
    %c0_11 = arith.constant 0 : index
    %9 = vector.load %arg7[%c0_10, %c0_11] : memref<1x32xf32, #tpu.memory_space<vmem>>, vector<1x32xf32>
    %10 = vector.broadcast %9 : vector<1x32xf32> to vector<32x32xf32>
    %11 = arith.addf %8, %10 : vector<32x32xf32>
    %c0_12 = arith.constant 0 : index
    %c0_13 = arith.constant 0 : index
    %12 = vector.load %arg10[%c0_12, %c0_13] : memref<32x32xf32, #tpu.memory_space<vmem>>, vector<32x32xf32>
    tpu.vector_store %arg10[%c0_12, %c0_13], %11 {strides = array<i32>} : memref<32x32xf32, #tpu.memory_space<vmem>>, vector<32x32xf32>,
    %c0_14 = arith.constant 0 : index
    %c0_15 = arith.constant 0 : index
    %13 = vector.load %arg5[%c0_14, %c0_15] : memref<32x32xf32, #tpu.memory_space<vmem>>, vector<32x32xf32>
    %cst_16 = arith.constant dense<0.000000e+00> : vector<32x32xf32>
    %14 = tpu.matmul %0, %13, %cst_16 {dimension_numbers = #tpu.dot_dimension_numbers<[1], [1], [0], [0], [0, 0, 1, 0], [], []>, precision = #tpu.contract_precision<fp32>} : vector<32x32xf32>, vector<32x32xf32>, vector<32x32xf32> -> vector<32x32xf32>
    %c0_17 = arith.constant 0 : index
    %c0_18 = arith.constant 0 : index
    %15 = vector.load %arg8[%c0_17, %c0_18] : memref<1x32xf32, #tpu.memory_space<vmem>>, vector<1x32xf32>
    %16 = vector.broadcast %15 : vector<1x32xf32> to vector<32x32xf32>
    %17 = arith.addf %14, %16 : vector<32x32xf32>
    %c0_19 = arith.constant 0 : index
    %c0_20 = arith.constant 0 : index
    %18 = vector.load %arg11[%c0_19, %c0_20] : memref<32x32xf32, #tpu.memory_space<vmem>>, vector<32x32xf32>
    tpu.vector_store %arg11[%c0_19, %c0_20], %17 {strides = array<i32>} : memref<32x32xf32, #tpu.memory_space<vmem>>, vector<32x32xf32>,
    return
  }
  func.func @transform_0(%arg0: i32, %arg1: i32) -> (i32, i32) {
    %c0_i32 = arith.constant 0 : i32
    %c0_i32_0 = arith.constant 0 : i32
    return %arg0, %c0_i32 : i32, i32
  }
  func.func @transform_1(%arg0: i32, %arg1: i32) -> (i32, i32) {
    %c0_i32 = arith.constant 0 : i32
    %c0_i32_0 = arith.constant 0 : i32
    return %arg1, %c0_i32 : i32, i32
  }
  func.func @transform_2(%arg0: i32, %arg1: i32) -> (i32, i32) {
    %c0_i32 = arith.constant 0 : i32
    %c0_i32_0 = arith.constant 0 : i32
    return %arg1, %c0_i32 : i32, i32
  }
  func.func @transform_3(%arg0: i32, %arg1: i32) -> (i32, i32) {
    %c0_i32 = arith.constant 0 : i32
    %c0_i32_0 = arith.constant 0 : i32
    return %arg1, %c0_i32 : i32, i32
  }
  func.func @transform_4(%arg0: i32, %arg1: i32) -> (i32, i32) {
    %c0_i32 = arith.constant 0 : i32
    %c0_i32_0 = arith.constant 0 : i32
    return %c0_i32, %arg1 : i32, i32
  }
  func.func @transform_5(%arg0: i32, %arg1: i32) -> (i32, i32) {
    %c0_i32 = arith.constant 0 : i32
    %c0_i32_0 = arith.constant 0 : i32
    return %c0_i32, %arg1 : i32, i32
  }
  func.func @transform_6(%arg0: i32, %arg1: i32) -> (i32, i32) {
    %c0_i32 = arith.constant 0 : i32
    %c0_i32_0 = arith.constant 0 : i32
    return %c0_i32, %arg1 : i32, i32
  }
  func.func @transform_7(%arg0: i32, %arg1: i32) -> (i32, i32) {
    %c0_i32 = arith.constant 0 : i32
    return %arg0, %arg1 : i32, i32
  }
  func.func @transform_8(%arg0: i32, %arg1: i32) -> (i32, i32) {
    %c0_i32 = arith.constant 0 : i32
    return %arg0, %arg1 : i32, i32
  }
  func.func @transform_9(%arg0: i32, %arg1: i32) -> (i32, i32) {
    %c0_i32 = arith.constant 0 : i32
    return %arg0, %arg1 : i32, i32
  }
}

</mosaic_0001>

<bundles_post_ra>
// kernel: tpu_custom_call.1
= control target key start
LH: loop header
LB: loop body
LE: loop exit
PB: predicated region body
PF: predicated region fallthrough
CT: control target
= control target key end

     0   :  { %15 = vsyncpa [#allocation3], 0  ;;  %s1597_s0 = inlined_call_operand.hbm [shape: f32[32,32], index: 0, kind: input, shape index: {}]   ;;  %s1598_s1 = inlined_call_operand.hbm [shape: f32[32,32], index: 1, kind: input, shape index: {}]   ;;  %s1599_s2 = inlined_call_operand.hbm [shape: f32[32,32], index: 2, kind: input, shape index: {}]   ;;  %s1600_s3 = inlined_call_operand.hbm [shape: f32[32,32], index: 3, kind: input, shape index: {}]   ;;  %s1601_s4 = inlined_call_operand.vmem [shape: f32[1,32], index: 4, kind: input, shape index: {}]   ;;  %s1602_s5 = inlined_call_operand.vmem [shape: f32[1,32], index: 5, kind: input, shape index: {}]   ;;  %s1603_s6 = inlined_call_operand.vmem [shape: f32[1,32], index: 6, kind: input, shape index: {}]   ;;  %s1604_s7 = inlined_call_operand.hbm [shape: f32[32,32], index: 7, kind: output, shape index: {0}]   ;;  %s1605_s8 = inlined_call_operand.hbm [shape: f32[32,32], index: 8, kind: output, shape index: {1}]   ;;  %s1606_s9 = inlined_call_operand.hbm [shape: f32[32,32], index: 9, kind: output, shape index: {2}]  }
   0x1   :  { %16 = vsyncpa [#allocation6], 0 }
   0x2   :  { %17 = vsyncpa [#allocation9], 0 }
   0x3   :  { %18 = vsyncpa [#allocation4], 0 }
   0x4   :  { %19 = vsyncpa [#allocation12], 0  ;;  %s37_s11 = sshll.u32 %s1598_s1, 4  ;;  %s1271_s12 = smov [#allocation5]   ;;  %s38_s11 = int_to_ptr.hbm [resolvable:$true] %s37_s11 }
   0x5   :  { %s39_s13 = sshll.u32 %s1271_s12, 4  ;;  %s24_s16 = sshll.u32 %s1597_s0, 4  ;;  %s40_s13 = int_to_ptr.vmem [resolvable:$true] %s39_s13  ;;  %s25_s16 = int_to_ptr.hbm [resolvable:$true] %s24_s16 }
   0x6   :  { %s1272_s17 = smov 128   ;;  %s1273_s18 = smov 8  }
   0x7   :  { %45 = dma.hbm_to_vmem [thread:$0]  %s38_s11, 512, %s40_s13, [#allocation6], %s1272_s17, %s1272_s17, %s1273_s18  }
   0x8   :  { %s1274_s19 = smov [#allocation2]   ;;  %s50_s1 = sshll.u32 %s1599_s2, 4  ;;  %s51_s1 = int_to_ptr.hbm [resolvable:$true] %s50_s1 }
   0x9   :  { %s26_s20 = sshll.u32 %s1274_s19, 4  ;;  %s63_s24 = sshll.u32 %s1600_s3, 4  ;;  %s27_s20 = int_to_ptr.vmem [resolvable:$true] %s26_s20  ;;  %s64_s24 = int_to_ptr.hbm [resolvable:$true] %s63_s24 }
   0xa   :  { %32 = dma.hbm_to_vmem [thread:$0]  %s25_s16, 512, %s27_s20, [#allocation3], %s1272_s17, %s1272_s17, %s1273_s18  }
   0xb   :  { %s1275_s25 = smov [#allocation7]   ;;  %s1276_s27 = smov [#allocation8]  }
   0xc   :  { %s52_s26 = sshll.u32 %s1275_s25, 4  ;;  %s65_s2 = sshll.u32 %s1276_s27, 4  ;;  %s53_s26 = int_to_ptr.vmem [resolvable:$true] %s52_s26  ;;  %s66_s2 = int_to_ptr.vmem [resolvable:$true] %s65_s2 }
   0xd   :  { %58 = dma.hbm_to_vmem [thread:$0]  %s51_s1, 512, %s53_s26, [#allocation6], %s1272_s17, %s1272_s17, %s1273_s18  }
   0xe   :  { %71 = dma.hbm_to_vmem [thread:$0]  %s64_s24, 512, %s66_s2, [#allocation9], %s1272_s17, %s1272_s17, %s1273_s18  }
   0xf   :  { %1261 = dma.done.wait [#allocation3], 512  }
  0x10   :  { %1262 = vsyncadd [#allocation3], 4294966784 }
  0x11   :  { %1263 = dma.done.wait [#allocation6], 1024  }
  0x12   :  { %1264 = vsyncadd [#allocation6], 4294966272 }
  0x13   :  { %1265 = dma.done.wait [#allocation9], 512  }
  0x14   :  { %1266 = vsyncadd [#allocation9], 4294966784  ;;  %vm106_vm0 = vcmask 261120   ;;  %v101_v0 = vld [vmem:[#allocation5 + $0x18] sm:$0xff]  ;;  %v100_v1 = vld [vmem:[#allocation5 + $0x10] sm:$0xff]  ;;  %s1023_s11 = sshll.u32 %s1604_s7, 4  ;;  %s1024_s11 = int_to_ptr.hbm [resolvable:$true] %s1023_s11 }
  0x15   :  { %v99_v2 = vld [vmem:[#allocation5 + $0x8] sm:$0xff]  ;;  %v129_v3 = vsel %vm106_vm0, %v101_v0, 0  ;;  %v126_v4 = vsel %vm106_vm0, %v100_v1, 0  ;;  %v98_v6 = vld [vmem:[#allocation5] sm:$0xff]  ;;  %v96_v7 = vld [vmem:[#allocation2 + $0x10] sm:$0xff]  ;;  %s1278_s14 = smov [#allocation11]  }
  0x16   :  { %v123_v5 = vsel %vm106_vm0, %v99_v2, 0  ;;  %v97_v8 = vld [vmem:[#allocation2 + $0x18] sm:$0xff]  ;;  %v1357_v9 = vand.u32 4294901760, %v129_v3  ;;  %v1359_v10 = vand.u32 4294901760, %v126_v4  ;;  %v120_v12 = vsel %vm106_vm0, %v98_v6, 0  ;;  %v94_v13 = vld [vmem:[#allocation2] sm:$0xff] }
  0x17   :  { %v1361_v11 = vand.u32 4294901760, %v123_v5  ;;  %v1364_v14 = vand.u32 4294901760, %v120_v12  ;;  %v114_v15 = vsel %vm106_vm0, %v96_v7, 0  ;;  %v117_v16 = vsel %vm106_vm0, %v97_v8, 0  ;;  %v95_v26 = vld [vmem:[#allocation2 + $0x8] sm:$0xff]  ;;  %v416_v42 = vld [vmem:[#allocation7 + $0x18] sm:$0xff] }
  0x18   :  { %v108_v17 = vsel %vm106_vm0, %v94_v13, 0  ;;  %1073 = vmatpush.xpose.msra.mxu2 %v1357_v9  ;;  %v197_v18 = vsub.f32 %v129_v3, %v1357_v9  ;;  %v203_v19 = vsub.f32 %v126_v4, %v1359_v10  ;;  %v1372_v20 = vand.u32 4294901760, %v114_v15  ;;  %144 = vmatpush.xpose.msra.mxu0 %v1357_v9  ;;  %v415_v51 = vld [vmem:[#allocation7 + $0x10] sm:$0xff]  ;;  %v414_v58 = vld [vmem:[#allocation7 + $0x8] sm:$0xff]  ;;  %v413_v4 = vld [vmem:[#allocation7] sm:$0xff]  ;;  %s1034_s15 = sshll.u32 %s1278_s14, 4  ;;  %s1035_s15 = int_to_ptr.vmem [resolvable:$true] %s1034_s15 }
  0x19   :  { %v1376_v21 = vsub.f32 %v123_v5, %v1361_v11  ;;  %v1378_v22 = vand.u32 4294901760, %v108_v17  ;;  %v1384_v27 = vsub.f32 %v120_v12, %v1364_v14  ;;  %v1386_v28 = vand.u32 4294901760, %v117_v16  ;;  %s1036_s20 = sshll.u32 %s1605_s8, 4  ;;  %s1049_s1 = sshll.u32 %s1606_s9, 4  ;;  %s1037_s20 = int_to_ptr.hbm [resolvable:$true] %s1036_s20  ;;  %s1050_s1 = int_to_ptr.hbm [resolvable:$true] %s1049_s1 }
  0x1a   :  { %v198_v23 = vand.u32 4294901760, %v197_v18  ;;  %v204_v24 = vand.u32 4294901760, %v203_v19  ;;  %v1381_v25 = vsub.f32 %v114_v15, %v1372_v20  ;;  %v111_v34 = vsel %vm106_vm0, %v95_v26, 0 }
  0x1b   :  { %v1389_v29 = vsub.f32 %v108_v17, %v1378_v22  ;;  %v210_v33 = vand.u32 4294901760, %v1376_v21  ;;  %v1404_v38 = vsub.f32 %v117_v16, %v1386_v28  ;;  %v216_v41 = vand.u32 4294901760, %v1384_v27 }
  0x1c   :  { %1074 = vmatpush.xpose.msra.mxu2 %v1359_v10  ;;  %v199_v30 = vsub.f32 %v197_v18, %v198_v23  ;;  %v205_v31 = vsub.f32 %v203_v19, %v204_v24  ;;  %v1393_v32 = vand.u32 4294901760, %v1381_v25  ;;  %146 = vmatpush.xpose.msra.mxu0 %v1359_v10  ;;  %v1409_v43 = vand.u32 4294901760, %v111_v34 }
  0x1d   :  { %v1399_v36 = vand.u32 4294901760, %v1389_v29  ;;  %v211_v40 = vsub.f32 %v1376_v21, %v210_v33  ;;  %v1417_v46 = vand.u32 4294901760, %v1404_v38  ;;  %v431_v47 = vsel %vm106_vm0, %v416_v42, 0 }
  0x1e   :  { %v200_v35 = vand.u32 4294901760, %v199_v30  ;;  %v170_v37 = vsub.f32 %v1381_v25, %v1393_v32  ;;  %v206_v39 = vand.u32 4294901760, %v205_v31  ;;  %v1421_v48 = vsub.f32 %v111_v34, %v1409_v43  ;;  %v717_v31 = vld [vmem:[#allocation8 + $0x10] sm:$0xff] }
  0x1f   :  { %v154_v44 = vsub.f32 %v1389_v29, %v1399_v36  ;;  %v212_v49 = vand.u32 4294901760, %v211_v40  ;;  %v217_v50 = vsub.f32 %v1384_v27, %v216_v41  ;;  %v1428_v53 = vand.u32 4294901760, %v431_v47  ;;  %v716_v40 = vld [vmem:[#allocation8 + $0x8] sm:$0xff] }
  0x20   :  { %1075 = vmatpush.xpose.msra.mxu2 %v1361_v11  ;;  %1077 = vmatpush.xpose.msra.mxu3 %v200_v35  ;;  %v1414_v45 = vand.u32 4294901760, %v170_v37  ;;  %v178_v54 = vsub.f32 %v1404_v38, %v1417_v46  ;;  %v1434_v55 = vand.u32 4294901760, %v1421_v48  ;;  %v428_v56 = vsel %vm106_vm0, %v415_v51, 0 }
  0x21   :  { %201 = vmatpush.xpose.msra.mxu1 %v200_v35  ;;  %148 = vmatpush.xpose.msra.mxu0 %v1361_v11  ;;  %v1426_v52 = vand.u32 4294901760, %v154_v44  ;;  %v218_v57 = vand.u32 4294901760, %v217_v50  ;;  %v499_v59 = vsub.f32 %v431_v47, %v1428_v53  ;;  %v1439_v60 = vand.u32 4294901760, %v428_v56  ;;  %v715_v50 = vld [vmem:[#allocation8] sm:$0xff] }
  0x22   :  { %v1441_v61 = vand.u32 4294901760, %v178_v54  ;;  %v162_v62 = vsub.f32 %v1421_v48, %v1434_v55  ;;  %v425_v63 = vsel %vm106_vm0, %v414_v58, 0  ;;  %v422_v5 = vsel %vm106_vm0, %v413_v4, 0 }
  0x23   :  { %v500_v0 = vand.u32 4294901760, %v499_v59  ;;  %v505_v1 = vsub.f32 %v428_v56, %v1439_v60  ;;  %v1449_v2 = vand.u32 4294901760, %v425_v63  ;;  %v1462_v12 = vand.u32 4294901760, %v422_v5 }
  0x24   :  { %1076 = vmatpush.xpose.msra.mxu2 %v1364_v14  ;;  %1078 = vmatpush.xpose.msra.mxu3 %v206_v39  ;;  %v1453_v3 = vand.u32 4294901760, %v162_v62  ;;  %v727_v42 = vsel %vm106_vm0, %v716_v40, 0  ;;  %v724_v51 = vsel %vm106_vm0, %v715_v50, 0 }
  0x25   :  { %207 = vmatpush.xpose.msra.mxu1 %v206_v39  ;;  %150 = vmatpush.xpose.msra.mxu0 %v1364_v14  ;;  %v501_v6 = vsub.f32 %v499_v59, %v500_v0  ;;  %v506_v7 = vand.u32 4294901760, %v505_v1  ;;  %v511_v8 = vsub.f32 %v425_v63, %v1449_v2  ;;  %v517_v16 = vsub.f32 %v422_v5, %v1462_v12 }
  0x26   :  { %v751_v44 = vand.u32 4294901760, %v727_v42  ;;  %v753_v54 = vand.u32 4294901760, %v724_v51 }
  0x27   :  { %172 = vmatmul.f32.vlgmr.msra.gmra.mxu2 %v1414_v45  ;;  %v507_v13 = vsub.f32 %v505_v1, %v506_v7  ;;  %v512_v15 = vand.u32 4294901760, %v511_v8 }
  0x28   :  { %251 = vmatpush.xpose.msrb.mxu2 %v197_v18  ;;  %1079 = vmatpush.xpose.msra.mxu3 %v212_v49  ;;  %v518_v18 = vand.u32 4294901760, %v517_v16 }
  0x29   :  { %342 = vmatpush.xpose.msrb.mxu0 %v198_v23  ;;  %213 = vmatpush.xpose.msra.mxu1 %v212_v49  ;;  %v513_v17 = vsub.f32 %v511_v8, %v512_v15  ;;  %v813_v49 = vsub.f32 %v727_v42, %v751_v44 }
  0x2a   :  { %156 = vmatmul.f32.vlgmr.msra.gmra.mxu0 %v1426_v52 }
  0x2c   :  { %254 = vmatpush.xpose.msrb.mxu2 %v203_v19  ;;  %1080 = vmatpush.xpose.msra.mxu3 %v218_v57  ;;  %v519_v19 = vsub.f32 %v517_v16, %v518_v18 }
  0x2d   :  { %346 = vmatpush.xpose.msrb.mxu0 %v204_v24  ;;  %219 = vmatpush.xpose.msra.mxu1 %v218_v57  ;;  %v819_v57 = vsub.f32 %v724_v51, %v753_v54 }
  0x2f   :  { %180 = vmatmul.f32.gmra.mxu2 %v1441_v61  ;;  %229 = vmatmul.f32.vlgmr.msra.gmra.mxu3 %v1372_v20 }
  0x30   :  { %295 = vmatpush.xpose.msrb.mxu3 %v1357_v9  ;;  %257 = vmatpush.xpose.msrb.mxu2 %v1376_v21  ;;  %v520_v21 = vand.u32 4294901760, %v519_v19 }
  0x31   :  { %385 = vmatpush.xpose.msrb.mxu1 %v1357_v9  ;;  %350 = vmatpush.xpose.msrb.mxu0 %v210_v33  ;;  %v502_v9 = vand.u32 4294901760, %v501_v6  ;;  %v730_v33 = vsel %vm106_vm0, %v717_v31, 0 }
  0x32   :  { %221 = vmatmul.f32.vlgmr.msra.gmra.mxu1 %v1378_v22  ;;  %164 = vmatmul.f32.gmra.mxu0 %v1453_v3  ;;  %v749_v35 = vand.u32 4294901760, %v730_v33 }
  0x34   :  { %297 = vmatpush.xpose.msrb.mxu3 %v1359_v10  ;;  %260 = vmatpush.xpose.msrb.mxu2 %v1384_v27  ;;  %v807_v37 = vsub.f32 %v730_v33, %v749_v35 }
  0x35   :  { %387 = vmatpush.xpose.msrb.mxu1 %v1359_v10  ;;  %354 = vmatpush.xpose.msrb.mxu0 %v216_v41  ;;  %v508_v10 = vand.u32 4294901760, %v507_v13 }
  0x36   :  { %v808_v39 = vand.u32 4294901760, %v807_v37 }
  0x37   :  { %233 = vmatmul.f32.gmra.mxu3 %v1386_v28  ;;  %263 = vmatmul.f32.vlgmr.msrb.gmra.mxu2 %v1389_v29 }
  0x38   :  { %446 = vmatpush.xpose.msra.mxu2 %v1428_v53  ;;  %299 = vmatpush.xpose.msrb.mxu3 %v1361_v11  ;;  %v809_v41 = vsub.f32 %v807_v37, %v808_v39 }
  0x39   :  { %553 = vmatpush.xpose.msra.mxu0 %v499_v59  ;;  %389 = vmatpush.xpose.msrb.mxu1 %v1361_v11  ;;  %v514_v11 = vand.u32 4294901760, %v513_v17  ;;  %v820_v59 = vand.u32 4294901760, %v819_v57 }
  0x3a   :  { %225 = vmatmul.f32.gmra.mxu1 %v1409_v43  ;;  %356 = vmatmul.f32.vlgmr.msrb.gmra.mxu0 %v1378_v22  ;;  %v810_v47 = vand.u32 4294901760, %v809_v41 }
  0x3c   :  { %448 = vmatpush.xpose.msra.mxu2 %v1439_v60  ;;  %301 = vmatpush.xpose.msrb.mxu3 %v1364_v14 }
  0x3d   :  { %556 = vmatpush.xpose.msra.mxu0 %v505_v1  ;;  %391 = vmatpush.xpose.msrb.mxu1 %v1364_v14  ;;  %v718_v14 = vld [vmem:[#allocation8 + $0x18] sm:$0xff] }
  0x3e   :  { %v733_v23 = vsel %vm106_vm0, %v718_v14, 0 }
  0x3f   :  { %268 = vmatmul.f32.gmra.mxu2 %v1421_v48  ;;  %305 = vmatmul.f32.vlgmr.msrb.gmra.mxu3 %v1399_v36  ;;  %v1490_v24 = vand.u32 4294901760, %v733_v23 }
  0x40   :  { %503 = vmatpush.xpose.msra.mxu3 %v502_v9  ;;  %450 = vmatpush.xpose.msra.mxu2 %v1449_v2 }
  0x41   :  { %597 = vmatpush.xpose.msra.mxu1 %v1428_v53  ;;  %559 = vmatpush.xpose.msra.mxu0 %v511_v8  ;;  %v801_v26 = vsub.f32 %v733_v23, %v1490_v24 }
  0x42   :  { %393 = vmatmul.f32.vlgmr.msrb.gmra.mxu1 %v1378_v22  ;;  %360 = vmatmul.f32.gmra.mxu0 %v1409_v43 }
  0x43   :  { %v802_v27 = vand.u32 4294901760, %v801_v26 }
  0x44   :  { %509 = vmatpush.xpose.msra.mxu3 %v508_v10  ;;  %452 = vmatpush.xpose.msra.mxu2 %v1462_v12 }
  0x45   :  { %599 = vmatpush.xpose.msra.mxu1 %v1439_v60  ;;  %562 = vmatpush.xpose.msra.mxu0 %v517_v16  ;;  %v803_v30 = vsub.f32 %v801_v26, %v802_v27 }
  0x47   :  { %273 = vmatmul.f32.gmra.mxu2 %v1381_v25  ;;  %311 = vmatmul.f32.gmra.mxu3 %v1434_v55  ;;  %v804_v34 = vand.u32 4294901760, %v803_v30 }
  0x48   :  { %644 = vmatpush.xpose.msrb.mxu2 %v500_v0  ;;  %515 = vmatpush.xpose.msra.mxu3 %v514_v11 }
  0x49   :  { %601 = vmatpush.xpose.msra.mxu1 %v1449_v2  ;;  %748 = vmatpush.xpose.msrb.mxu0 %v1490_v24 }
  0x4a   :  { %397 = vmatmul.f32.gmra.mxu1 %v1409_v43  ;;  %364 = vmatmul.f32.gmra.mxu0 %v1372_v20 }
  0x4c   :  { %648 = vmatpush.xpose.msrb.mxu2 %v506_v7  ;;  %521 = vmatpush.xpose.msra.mxu3 %v520_v21 }
  0x4d   :  { %603 = vmatpush.xpose.msra.mxu1 %v1462_v12  ;;  %750 = vmatpush.xpose.msrb.mxu0 %v749_v35 }
  0x4f   :  { %278 = vmatmul.f32.gmra.mxu2 %v1404_v38  ;;  %317 = vmatmul.f32.gmra.mxu3 %v1393_v32 }
  0x50   :  { %687 = vmatpush.xpose.msrb.mxu3 %v1428_v53  ;;  %652 = vmatpush.xpose.msrb.mxu2 %v512_v15  ;;  %v814_v53 = vand.u32 4294901760, %v813_v49 }
  0x51   :  { %805 = vmatpush.xpose.msrb.mxu1 %v804_v34  ;;  %752 = vmatpush.xpose.msrb.mxu0 %v751_v44 }
  0x52   :  { %401 = vmatmul.f32.gmra.mxu1 %v1372_v20  ;;  %368 = vmatmul.f32.gmra.mxu0 %v1386_v28  ;;  %v815_v56 = vsub.f32 %v813_v49, %v814_v53 }
  0x54   :  { %689 = vmatpush.xpose.msrb.mxu3 %v1439_v60  ;;  %656 = vmatpush.xpose.msrb.mxu2 %v518_v18  ;;  %v816_v58 = vand.u32 4294901760, %v815_v56  ;;  %v821_v60 = vsub.f32 %v819_v57, %v820_v59 }
  0x55   :  { %811 = vmatpush.xpose.msrb.mxu1 %v810_v47  ;;  %754 = vmatpush.xpose.msrb.mxu0 %v753_v54 }
  0x56   :  { %v822_v62 = vand.u32 4294901760, %v821_v60 }
  0x57   :  { %323 = vmatmul.f32.gmra.mxu3 %v1417_v46  ;;  %458 = vmatmul.f32.vlgmr.msra.gmra.mxu2 %v1426_v52 }
  0x58   :  { %691 = vmatpush.xpose.msrb.mxu3 %v1449_v2  ;;  %855 = vmatpush.xpose.msra.mxu2 %v801_v26 }
  0x59   :  { %817 = vmatpush.xpose.msrb.mxu1 %v816_v58 }
  0x5a   :  { %405 = vmatmul.f32.gmra.mxu1 %v1386_v28  ;;  %565 = vmatmul.f32.vlgmr.msra.gmra.mxu0 %v1389_v29 }
  0x5b   :  { %946 = vmatpush.xpose.msra.mxu0 %v802_v27 }
  0x5c   :  { %693 = vmatpush.xpose.msrb.mxu3 %v1462_v12  ;;  %858 = vmatpush.xpose.msra.mxu2 %v807_v37 }
  0x5d   :  { %823 = vmatpush.xpose.msrb.mxu1 %v822_v62 }
  0x5f   :  { %466 = vmatmul.f32.gmra.mxu2 %v1453_v3  ;;  %523 = vmatmul.f32.vlgmr.msra.gmra.mxu3 %v1378_v22 }
  0x60   :  { %899 = vmatpush.xpose.msra.mxu3 %v1490_v24  ;;  %861 = vmatpush.xpose.msra.mxu2 %v813_v49 }
  0x61   :  { %950 = vmatpush.xpose.msra.mxu0 %v808_v39 }
  0x62   :  { %607 = vmatmul.f32.vlgmr.msra.gmra.mxu1 %v1399_v36  ;;  %570 = vmatmul.f32.gmra.mxu0 %v1421_v48 }
  0x63   :  { %989 = vmatpush.xpose.msra.mxu1 %v1490_v24 }
  0x64   :  { %901 = vmatpush.xpose.msra.mxu3 %v749_v35  ;;  %864 = vmatpush.xpose.msra.mxu2 %v819_v57  ;;  %v1091_v57 = vld [vmem:[%s1602_s5] ss:$0 sm:$0xff] }
  0x65   :  { %954 = vmatpush.xpose.msra.mxu0 %v814_v53 }
  0x67   :  { %474 = vmatmul.f32.gmra.mxu2 %v1414_v45  ;;  %527 = vmatmul.f32.gmra.mxu3 %v1409_v43 }
  0x68   :  { %903 = vmatpush.xpose.msra.mxu3 %v751_v44  ;;  %991 = vmatpush.xpose.msra.mxu1 %v749_v35 }
  0x69   :  { %958 = vmatpush.xpose.msra.mxu0 %v820_v59 }
  0x6a   :  { %613 = vmatmul.f32.gmra.mxu1 %v1434_v55  ;;  %575 = vmatmul.f32.gmra.mxu0 %v1381_v25 }
  0x6c   :  { %905 = vmatpush.xpose.msra.mxu3 %v753_v54  ;;  %993 = vmatpush.xpose.msra.mxu1 %v751_v44 }
  0x6f   :  { %482 = vmatmul.f32.gmra.mxu2 %v1441_v61  ;;  %531 = vmatmul.f32.gmra.mxu3 %v1372_v20 }
  0x70   :  { %995 = vmatpush.xpose.msra.mxu1 %v753_v54 }
  0x72   :  { %619 = vmatmul.f32.gmra.mxu1 %v1393_v32  ;;  %580 = vmatmul.f32.gmra.mxu0 %v1404_v38 }
  0x77   :  { %535 = vmatmul.f32.gmra.mxu3 %v1386_v28  ;;  %658 = vmatmul.f32.vlgmr.msrb.gmra.mxu2 %v1378_v22 }
  0x7a   :  { %625 = vmatmul.f32.gmra.mxu1 %v1417_v46  ;;  %760 = vmatmul.f32.vlgmr.msrb.gmra.mxu0 %v1426_v52 }
  0x7f   :  { %662 = vmatmul.f32.gmra.mxu2 %v1409_v43  ;;  %695 = vmatmul.f32.vlgmr.msrb.gmra.mxu3 %v1378_v22 }
  0x82   :  { %825 = vmatmul.f32.vlgmr.msrb.gmra.mxu1 %v1378_v22  ;;  %768 = vmatmul.f32.gmra.mxu0 %v1453_v3 }
  0x87   :  { %666 = vmatmul.f32.gmra.mxu2 %v1372_v20  ;;  %699 = vmatmul.f32.gmra.mxu3 %v1409_v43 }
  0x8a   :  { %829 = vmatmul.f32.gmra.mxu1 %v1409_v43  ;;  %776 = vmatmul.f32.gmra.mxu0 %v1414_v45 }
  0x8f   :  { %670 = vmatmul.f32.gmra.mxu2 %v1386_v28  ;;  %703 = vmatmul.f32.gmra.mxu3 %v1372_v20 }
  0x92   :  { %833 = vmatmul.f32.gmra.mxu1 %v1372_v20  ;;  %784 = vmatmul.f32.gmra.mxu0 %v1441_v61 }
  0x97   :  { %707 = vmatmul.f32.gmra.mxu3 %v1386_v28  ;;  %867 = vmatmul.f32.vlgmr.msra.gmra.mxu2 %v1389_v29 }
  0x9a   :  { %837 = vmatmul.f32.gmra.mxu1 %v1386_v28  ;;  %960 = vmatmul.f32.vlgmr.msra.gmra.mxu0 %v1378_v22 }
  0x9f   :  { %872 = vmatmul.f32.gmra.mxu2 %v1421_v48  ;;  %909 = vmatmul.f32.vlgmr.msra.gmra.mxu3 %v1399_v36 }
  0xa2   :  { %997 = vmatmul.f32.vlgmr.msra.gmra.mxu1 %v1378_v22  ;;  %964 = vmatmul.f32.gmra.mxu0 %v1409_v43 }
  0xa7   :  { %877 = vmatmul.f32.gmra.mxu2 %v1381_v25  ;;  %915 = vmatmul.f32.gmra.mxu3 %v1434_v55  ;;  %v157_v45 = vpop.f32.mrf.mxu0 }
  0xaa   :  { %v173_v52 = vpop.f32.mrf.mxu2  ;;  %1001 = vmatmul.f32.gmra.mxu1 %v1409_v43  ;;  %968 = vmatmul.f32.gmra.mxu0 %v1372_v20  ;;  %v1090_v43 = vld [vmem:[%s1601_s4] ss:$0 sm:$0xff]  ;;  %s1277_s4 = smov [#allocation10]  }
  0xab   :  { %s1021_s29 = sshll.u32 %s1277_s4, 4  ;;  %s1022_s29 = int_to_ptr.vmem [resolvable:$true] %s1021_s29 }
  0xaf   :  { %882 = vmatmul.f32.gmra.mxu2 %v1404_v38  ;;  %921 = vmatmul.f32.gmra.mxu3 %v1393_v32  ;;  %v222_v29 = vpop.f32.mrf.mxu1  ;;  %v165_v36 = vpop.f32.mrf.mxu0  ;;  %v158_v32 = vadd.f32 %v1090_v43, %v157_v45 }
  0xb0   :  { %v166_v4 = vadd.f32 %v1090_v43, %v165_v36 }
  0xb1   :  { %v223_v63 = vadd.f32 %v222_v29, %v158_v32 }
  0xb2   :  { %v181_v48 = vpop.f32.mrf.mxu2  ;;  %v230_v22 = vpop.f32.mrf.mxu3  ;;  %1005 = vmatmul.f32.gmra.mxu1 %v1372_v20  ;;  %972 = vmatmul.f32.gmra.mxu0 %v1386_v28 }
  0xb3   :  { %v182_v24 = vadd.f32 %v1090_v43, %v181_v48 }
  0xb7   :  { %927 = vmatmul.f32.gmra.mxu3 %v1417_v46  ;;  %v226_v25 = vpop.f32.mrf.mxu1  ;;  %v357_v55 = vpop.f32.mrf.mxu0 }
  0xb8   :  { %v227_v6 = vadd.f32 %v226_v25, %v166_v4 }
  0xba   :  { %v234_v61 = vpop.f32.mrf.mxu3  ;;  %v264_v38 = vpop.f32.mrf.mxu2  ;;  %1009 = vmatmul.f32.gmra.mxu1 %v1386_v28  ;;  %v174_v28 = vadd.f32 %v1090_v43, %v173_v52 }
  0xbb   :  { %v265_v2 = vadd.f32 %v264_v38, %v223_v63  ;;  %v235_v30 = vadd.f32 %v234_v61, %v182_v24  ;;  %v1092_v24 = vld [vmem:[%s1603_s6] ss:$0 sm:$0xff]  ;;  %s1279_s6 = smov [#allocation13]  }
  0xbc   :  { %v231_v17 = vadd.f32 %v230_v22, %v174_v28  ;;  %s1047_s8 = sshll.u32 %s1279_s6, 4  ;;  %s1048_s8 = int_to_ptr.vmem [resolvable:$true] %s1047_s8 }
  0xbf   :  { %v394_v0 = vpop.f32.mrf.mxu1  ;;  %v361_v1 = vpop.f32.mrf.mxu0 }
  0xc2   :  { %v269_v20 = vpop.f32.mrf.mxu2  ;;  %v306_v3 = vpop.f32.mrf.mxu3 }
  0xc3   :  { %v307_v5 = vadd.f32 %v306_v3, %v265_v2  ;;  %v270_v9 = vadd.f32 %v269_v20, %v227_v6 }
  0xc5   :  { %v358_v46 = vadd.f32 %v357_v55, %v307_v5 }
  0xc7   :  { %v395_v7 = vadd.f32 %v394_v0, %v358_v46  ;;  %v398_v8 = vpop.f32.mrf.mxu1  ;;  %v365_v12 = vpop.f32.mrf.mxu0 }
  0xc9   :  { %409 = vst.msk [vmem:[#allocation10] sm:$0xff] %vm106_vm0, %v395_v7 }
  0xca   :  { %v274_v13 = vpop.f32.mrf.mxu2  ;;  %v312_v15 = vpop.f32.mrf.mxu3 }
  0xcb   :  { %v313_v16 = vadd.f32 %v312_v15, %v270_v9  ;;  %v275_v21 = vadd.f32 %v274_v13, %v231_v17 }
  0xcd   :  { %v362_v10 = vadd.f32 %v361_v1, %v313_v16 }
  0xcf   :  { %v399_v18 = vadd.f32 %v398_v8, %v362_v10  ;;  %v402_v11 = vpop.f32.mrf.mxu1  ;;  %v369_v19 = vpop.f32.mrf.mxu0 }
  0xd1   :  { %410 = vst.msk [vmem:[#allocation10 + $0x8] sm:$0xff] %vm106_vm0, %v399_v18 }
  0xd2   :  { %v279_v14 = vpop.f32.mrf.mxu2  ;;  %v318_v23 = vpop.f32.mrf.mxu3 }
  0xd3   :  { %v319_v26 = vadd.f32 %v318_v23, %v275_v21  ;;  %v280_v35 = vadd.f32 %v279_v14, %v235_v30 }
  0xd5   :  { %v366_v27 = vadd.f32 %v365_v12, %v319_v26 }
  0xd7   :  { %v403_v31 = vadd.f32 %v402_v11, %v366_v27  ;;  %v406_v33 = vpop.f32.mrf.mxu1  ;;  %v566_v34 = vpop.f32.mrf.mxu0 }
  0xd9   :  { %411 = vst.msk [vmem:[#allocation10 + $0x10] sm:$0xff] %vm106_vm0, %v403_v31 }
  0xda   :  { %v324_v37 = vpop.f32.mrf.mxu3  ;;  %v459_v39 = vpop.f32.mrf.mxu2 }
  0xdb   :  { %v325_v40 = vadd.f32 %v324_v37, %v280_v35  ;;  %v460_v45 = vadd.f32 %v1091_v57, %v459_v39 }
  0xdd   :  { %v370_v41 = vadd.f32 %v369_v19, %v325_v40 }
  0xdf   :  { %v407_v42 = vadd.f32 %v406_v33, %v370_v41  ;;  %v608_v44 = vpop.f32.mrf.mxu1  ;;  %v571_v47 = vpop.f32.mrf.mxu0 }
  0xe1   :  { %412 = vst.msk [vmem:[#allocation10 + $0x18] sm:$0xff] %vm106_vm0, %v407_v42 }
  0xe2   :  { %v467_v49 = vpop.f32.mrf.mxu2  ;;  %v524_v50 = vpop.f32.mrf.mxu3  ;;  %1029 = dma.vmem_to_hbm [thread:$0]  %s1022_s29, 512, %s1024_s11, [#allocation4], %s1272_s17, %s1272_s17, %s1273_s18  }
  0xe3   :  { %v525_v52 = vadd.f32 %v524_v50, %v460_v45  ;;  %v468_v25 = vadd.f32 %v1091_v57, %v467_v49 }
  0xe5   :  { %v567_v55 = vadd.f32 %v566_v34, %v525_v52 }
  0xe7   :  { %v614_v51 = vpop.f32.mrf.mxu1  ;;  %v576_v53 = vpop.f32.mrf.mxu0  ;;  %v609_v43 = vadd.f32 %v608_v44, %v567_v55 }
  0xea   :  { %v475_v54 = vpop.f32.mrf.mxu2  ;;  %v528_v56 = vpop.f32.mrf.mxu3 }
  0xeb   :  { %v529_v61 = vadd.f32 %v528_v56, %v468_v25  ;;  %v476_v2 = vadd.f32 %v1091_v57, %v475_v54 }
  0xed   :  { %v572_v20 = vadd.f32 %v571_v47, %v529_v61 }
  0xef   :  { %v620_v58 = vpop.f32.mrf.mxu1  ;;  %v581_v59 = vpop.f32.mrf.mxu0  ;;  %v615_v4 = vadd.f32 %v614_v51, %v572_v20 }
  0xf2   :  { %v483_v60 = vpop.f32.mrf.mxu2  ;;  %v532_v62 = vpop.f32.mrf.mxu3 }
  0xf3   :  { %v533_v5 = vadd.f32 %v532_v62, %v476_v2  ;;  %v484_v9 = vadd.f32 %v1091_v57, %v483_v60 }
  0xf5   :  { %v577_v13 = vadd.f32 %v576_v53, %v533_v5 }
  0xf7   :  { %v626_v29 = vpop.f32.mrf.mxu1  ;;  %v761_v36 = vpop.f32.mrf.mxu0  ;;  %v621_v28 = vadd.f32 %v620_v58, %v577_v13 }
  0xf8   :  { %v762_v33 = vadd.f32 %v1092_v24, %v761_v36 }
  0xfa   :  { %v536_v48 = vpop.f32.mrf.mxu3  ;;  %v659_v22 = vpop.f32.mrf.mxu2 }
  0xfb   :  { %v660_v63 = vadd.f32 %v659_v22, %v609_v43  ;;  %v537_v16 = vadd.f32 %v536_v48, %v484_v9 }
  0xfd   :  { %v582_v21 = vadd.f32 %v581_v59, %v537_v16 }
  0xff   :  { %v826_v38 = vpop.f32.mrf.mxu1  ;;  %v769_v32 = vpop.f32.mrf.mxu0  ;;  %v627_v23 = vadd.f32 %v626_v29, %v582_v21 }
 0x100   :  { %v827_v37 = vadd.f32 %v826_v38, %v762_v33  ;;  %v770_v44 = vadd.f32 %v1092_v24, %v769_v32 }
 0x102   :  { %v663_v0 = vpop.f32.mrf.mxu2  ;;  %v696_v1 = vpop.f32.mrf.mxu3 }
 0x103   :  { %v697_v3 = vadd.f32 %v696_v1, %v660_v63  ;;  %v664_v7 = vadd.f32 %v663_v0, %v615_v4 }
 0x105   :  { %711 = vst.msk [vmem:[#allocation11] sm:$0xff] %vm106_vm0, %v697_v3 }
 0x107   :  { %v830_v46 = vpop.f32.mrf.mxu1  ;;  %v777_v6 = vpop.f32.mrf.mxu0 }
 0x108   :  { %v831_v51 = vadd.f32 %v830_v46, %v770_v44  ;;  %v778_v58 = vadd.f32 %v1092_v24, %v777_v6 }
 0x10a   :  { %v667_v8 = vpop.f32.mrf.mxu2  ;;  %v700_v12 = vpop.f32.mrf.mxu3 }
 0x10b   :  { %v701_v15 = vadd.f32 %v700_v12, %v664_v7  ;;  %v668_v17 = vadd.f32 %v667_v8, %v621_v28 }
 0x10d   :  { %712 = vst.msk [vmem:[#allocation11 + $0x8] sm:$0xff] %vm106_vm0, %v701_v15 }
 0x10f   :  { %v834_v10 = vpop.f32.mrf.mxu1  ;;  %v785_v18 = vpop.f32.mrf.mxu0 }
 0x110   :  { %v835_v45 = vadd.f32 %v834_v10, %v778_v58  ;;  %v786_v25 = vadd.f32 %v1092_v24, %v785_v18 }
 0x112   :  { %v671_v11 = vpop.f32.mrf.mxu2  ;;  %v704_v19 = vpop.f32.mrf.mxu3 }
 0x113   :  { %v705_v14 = vadd.f32 %v704_v19, %v668_v17  ;;  %v672_v27 = vadd.f32 %v671_v11, %v627_v23 }
 0x115   :  { %713 = vst.msk [vmem:[#allocation11 + $0x10] sm:$0xff] %vm106_vm0, %v705_v14 }
 0x117   :  { %v838_v26 = vpop.f32.mrf.mxu1  ;;  %v961_v35 = vpop.f32.mrf.mxu0 }
 0x118   :  { %v839_v38 = vadd.f32 %v838_v26, %v786_v25 }
 0x11a   :  { %v708_v30 = vpop.f32.mrf.mxu3  ;;  %v868_v31 = vpop.f32.mrf.mxu2 }
 0x11b   :  { %v709_v34 = vadd.f32 %v708_v30, %v672_v27  ;;  %v869_v40 = vadd.f32 %v868_v31, %v827_v37 }
 0x11d   :  { %714 = vst.msk [vmem:[#allocation11 + $0x18] sm:$0xff] %vm106_vm0, %v709_v34 }
 0x11e   :  { %1042 = dma.vmem_to_hbm [thread:$0]  %s1035_s15, 512, %s1037_s20, [#allocation12], %s1272_s17, %s1272_s17, %s1273_s18  }
 0x11f   :  { %v998_v39 = vpop.f32.mrf.mxu1  ;;  %v965_v50 = vpop.f32.mrf.mxu0 }
 0x122   :  { %v873_v41 = vpop.f32.mrf.mxu2  ;;  %v910_v42 = vpop.f32.mrf.mxu3 }
 0x123   :  { %v911_v47 = vadd.f32 %v910_v42, %v869_v40  ;;  %v874_v56 = vadd.f32 %v873_v41, %v831_v51 }
 0x125   :  { %v962_v49 = vadd.f32 %v961_v35, %v911_v47 }
 0x127   :  { %v999_v53 = vadd.f32 %v998_v39, %v962_v49  ;;  %v1002_v54 = vpop.f32.mrf.mxu1  ;;  %v969_v29 = vpop.f32.mrf.mxu0 }
 0x129   :  { %1013 = vst.msk [vmem:[#allocation13] sm:$0xff] %vm106_vm0, %v999_v53 }
 0x12a   :  { %v916_v57 = vpop.f32.mrf.mxu3  ;;  %v878_v60 = vpop.f32.mrf.mxu2 }
 0x12b   :  { %v917_v59 = vadd.f32 %v916_v57, %v874_v56  ;;  %v879_v36 = vadd.f32 %v878_v60, %v835_v45 }
 0x12d   :  { %v966_v62 = vadd.f32 %v965_v50, %v917_v59 }
 0x12f   :  { %v1003_v52 = vadd.f32 %v1002_v54, %v966_v62  ;;  %v1006_v22 = vpop.f32.mrf.mxu1  ;;  %v973_v1 = vpop.f32.mrf.mxu0 }
 0x131   :  { %1014 = vst.msk [vmem:[#allocation13 + $0x8] sm:$0xff] %vm106_vm0, %v1003_v52 }
 0x132   :  { %v922_v48 = vpop.f32.mrf.mxu3  ;;  %v883_v61 = vpop.f32.mrf.mxu2 }
 0x133   :  { %v923_v55 = vadd.f32 %v922_v48, %v879_v36  ;;  %v884_v63 = vadd.f32 %v883_v61, %v839_v38 }
 0x135   :  { %v970_v43 = vadd.f32 %v969_v29, %v923_v55 }
 0x137   :  { %v1007_v32 = vadd.f32 %v1006_v22, %v970_v43  ;;  %v1010_v20 = vpop.f32.mrf.mxu1 }
 0x139   :  { %1015 = vst.msk [vmem:[#allocation13 + $0x10] sm:$0xff] %vm106_vm0, %v1007_v32 }
 0x13a   :  { %v928_v0 = vpop.f32.mrf.mxu3 }
 0x13b   :  { %v929_v2 = vadd.f32 %v928_v0, %v884_v63 }
 0x13d   :  { %v974_v3 = vadd.f32 %v973_v1, %v929_v2 }
 0x13f   :  { %v1011_v4 = vadd.f32 %v1010_v20, %v974_v3 }
 0x141   :  { %1016 = vst.msk [vmem:[#allocation13 + $0x18] sm:$0xff] %vm106_vm0, %v1011_v4 }
 0x142   :  { %1055 = dma.vmem_to_hbm [thread:$0]  %s1048_s8, 512, %s1050_s1, [#allocation12], %s1272_s17, %s1272_s17, %s1273_s18  }
 0x143   :  { %1267 = dma.done.wait [#allocation4], 512  }
 0x144   :  { %1268 = vsyncadd [#allocation4], 4294966784 }
 0x145   :  { %1269 = dma.done.wait [#allocation12], 1024  }
 0x146   :  { %1270 = vsyncadd [#allocation12], 4294966272 }
 0x147   :  { %1068 = vsyncpa [#allocation3], 1 }
 0x148   :  { %1069 = vsyncpa [#allocation6], 1 }
 0x149   :  { %1070 = vsyncpa [#allocation9], 1 }
 0x14a   :  { %1071 = vsyncpa [#allocation4], 1 }
 0x14b   :  { %1072 = vsyncpa [#allocation12], 1 }

</bundles_post_ra>
